<compile_context>
chip_gen: v7x
topology: tpu7x:2x2x1
jax: 0.10.0
libtpu: 0.0.40
codegen_flags: <defaults>
</compile_context>

<pallas_src>
import jax
import jax.numpy as jnp
from jax.experimental import pallas as pl
from jax.experimental.pallas import tpu as pltpu


def _round_up(x, m):
    return ((x + m - 1) // m) * m


def _vmem_budget_bytes():
    """Usable VMEM budget: physical capacity minus headroom for Mosaic scratch."""
    try:
        cap = pltpu.get_tpu_info().vmem_capacity_bytes
    except Exception:
        cap = 64 * 1024 * 1024  # v7x has the smallest physical VMEM; safe floor.
    return int(cap * 3 // 4)


def _m_axis_semantics():
    """CORE_PARALLEL shards the M axis across TensorCores on 2-TC chips (v7x);
    plain "parallel" elsewhere (measured no-op on single-TC v5e/v6e)."""
    try:
        info = pltpu.get_tpu_info()
        n_cores = getattr(info, "num_cores", None) or getattr(info, "core_count", 1)
        if n_cores and n_cores > 1 and hasattr(pltpu, "CORE_PARALLEL"):
            return pltpu.CORE_PARALLEL
    except Exception:
        pass
    return "parallel"


# ---------------------------------------------------------------------------
# Fused path: raw NCHW image in, unfold done on the VMEM tile.
# ---------------------------------------------------------------------------
def _make_fused_kernel(C, hp, wp, p, K):
    L = hp * wp

    def kernel(img_ref, w_ref, out_ref):
        x = img_ref[0]                           # (C, H, W) for one image
        x = x.reshape(C, hp, p, wp, p)
        x = x.transpose(1, 3, 0, 2, 4)           # (hp, wp, C, p, p): F.unfold order
        a = x.reshape(L, K)                      # [L, C*p*p]
        y = jnp.dot(a, w_ref[...], preferred_element_type=jnp.float32)
        out_ref[0] = y.astype(out_ref.dtype)

    return kernel


def _patch_embedding_fused(image, weight, p, hp, wp, out_dtype):
    N, C, H, W = image.shape
    L, K, D = hp * wp, C * p * p, weight.shape[1]

    # Lane-dense output columns (full `vst`, full MXU result columns).
    Dp = _round_up(D, 128)
    if Dp != D:
        weight = jnp.pad(weight, ((0, 0), (0, Dp - D)))

    in_it = jnp.dtype(image.dtype).itemsize
    out_it = jnp.dtype(out_dtype).itemsize
    vmem_need = (2 * (C * H * W * in_it + L * Dp * out_it)   # dbl-buffered img / out
                 + 2 * K * Dp * in_it                        # resident weight
                 + L * (K * in_it + Dp * 4)                  # in-kernel A + f32 result
                 + (4 << 20))
    vmem_limit = int(min(max(vmem_need, 32 * 1024 * 1024), _vmem_budget_bytes()))

    out = pl.pallas_call(
        _make_fused_kernel(C, hp, wp, p, K),
        out_shape=jax.ShapeDtypeStruct((N, L, Dp), out_dtype),
        grid_spec=pltpu.PrefetchScalarGridSpec(
            num_scalar_prefetch=0,
            grid=(N,),
            in_specs=[
                pl.BlockSpec((1, C, H, W), lambda n: (n, 0, 0, 0)),  # raw NCHW image
                pl.BlockSpec((K, Dp), lambda n: (0, 0)),             # weight resident
            ],
            out_specs=pl.BlockSpec((1, L, Dp), lambda n: (n, 0, 0)),
        ),
        compiler_params=pltpu.CompilerParams(
            dimension_semantics=(_m_axis_semantics(),),
            vmem_limit_bytes=vmem_limit,
        ),
    )(image, weight)

    if Dp != D:
        out = out[..., :D]
    return out


# ---------------------------------------------------------------------------
# Unfused fallback: XLA unfold + tiled matmul (always lowers).
# ---------------------------------------------------------------------------
def _matmul_kernel(patch_ref, w_ref, out_ref):
    out_ref[...] = jnp.dot(
        patch_ref[...], w_ref[...], preferred_element_type=jnp.float32
    ).astype(out_ref.dtype)


def _patch_embedding_unfused(image, weight, p, hp, wp, out_dtype, tm, pad_k):
    N, C, H, W = image.shape
    L, K, D = hp * wp, C * p * p, weight.shape[1]

    # XLA unfold: costs one extra HBM round trip of the [M, K] activation.
    patches = image.reshape(N, C, hp, p, wp, p)
    patches = patches.transpose(0, 2, 4, 1, 3, 5).reshape(N * L, K)

    Kp = _round_up(K, 128) if pad_k else K
    if Kp != K:
        patches = jnp.pad(patches, ((0, 0), (0, Kp - K)))
        weight = jnp.pad(weight, ((0, Kp - K), (0, 0)))
    Dp = _round_up(D, 128)
    if Dp != D:
        weight = jnp.pad(weight, ((0, 0), (0, Dp - D)))

    M = N * L
    in_it = jnp.dtype(patches.dtype).itemsize
    out_it = jnp.dtype(out_dtype).itemsize
    budget = _vmem_budget_bytes()
    w_bytes = 2 * Kp * Dp * in_it

    def vmem_need(t):  # dbl-buffered patch + out tiles, resident weight, slack
        return 2 * t * (Kp * in_it + Dp * out_it) + w_bytes + (2 << 20)

    tm = min(tm, _round_up(M, 16))
    while tm > 16 and vmem_need(tm) > budget:
        tm //= 2

    Mp = _round_up(M, tm)
    if Mp != M:
        patches = jnp.pad(patches, ((0, Mp - M), (0, 0)))
    vmem_limit = int(min(max(vmem_need(tm), 32 * 1024 * 1024), budget))

    out = pl.pallas_call(
        _matmul_kernel,
        out_shape=jax.ShapeDtypeStruct((Mp, Dp), out_dtype),
        grid_spec=pltpu.PrefetchScalarGridSpec(
            num_scalar_prefetch=0,
            grid=(Mp // tm,),
            in_specs=[
                pl.BlockSpec((tm, Kp), lambda i: (i, 0)),   # patch-row tile
                pl.BlockSpec((Kp, Dp), lambda i: (0, 0)),   # weight resident
            ],
            out_specs=pl.BlockSpec((tm, Dp), lambda i: (i, 0)),
        ),
        compiler_params=pltpu.CompilerParams(
            dimension_semantics=(_m_axis_semantics(),),
            vmem_limit_bytes=vmem_limit,
        ),
    )(patches, weight)

    return out[:M, :D].reshape(N, L, D)


# ---------------------------------------------------------------------------
# Public entry point.
# ---------------------------------------------------------------------------
def patch_embedding(image, weight, patch_size, *, compute_dtype=None, out_dtype=None,
                    fuse_unfold=True, tm=512, pad_k=False):
    """image: [N, C, H, W] (NCHW); weight: [C*p*p, patch_dim] -> [N, L, patch_dim]."""
    N, C, H, W = image.shape
    p = patch_size
    hp, wp = H // p, W // p
    assert hp > 0 and wp > 0
    assert weight.shape[0] == C * p * p

    # F.unfold silently drops the spatial remainder; mimic by cropping.
    if H != hp * p or W != wp * p:
        image = image[:, :, : hp * p, : wp * p]

    # Output dtype defaults to the (pre-cast) input dtype == PyTorch semantics.
    out_dtype = jnp.dtype(out_dtype if out_dtype is not None else image.dtype)
    if compute_dtype is not None:
        image = image.astype(compute_dtype)    # halves HBM traffic in bf16 path
        weight = weight.astype(compute_dtype)
    else:
        weight = weight.astype(image.dtype)

    if fuse_unfold:
        try:
            out = _patch_embedding_fused(image, weight, p, hp, wp, out_dtype)
            if hasattr(out, "block_until_ready"):
                out.block_until_ready()   # surface lowering/runtime errors here
            return out
        except Exception:
            # TODO(synk): the fused path's in-kernel (c, kh, kw) relayout is the
            # only piece Mosaic may refuse to lower at odd shapes; fall back to
            # the XLA-unfold + tiled-matmul path, which always lowers.
            pass
    return _patch_embedding_unfused(image, weight, p, hp, wp, out_dtype, tm, pad_k)


if __name__ == "__main__":
    # Small shapes consistent with the module: channels fixed to 3 by __init__.
    patch_size = 4
    patch_dim = 32
    batch_seq = 2
    C, H, W = 3, 16, 16

    key = jax.random.PRNGKey(0)
    k_img, k_w = jax.random.split(key)
    image = jax.random.normal(k_img, (batch_seq, C, H, W), dtype=jnp.float32)
    weight = jax.random.normal(
        k_w, (patch_size * patch_size * C, patch_dim), dtype=jnp.float32)

    # Pure-JAX reference with F.unfold's (c, kh, kw) column ordering.
    hp, wp = H // patch_size, W // patch_size
    ref_patches = image.reshape(batch_seq, C, hp, patch_size, wp, patch_size)
    ref_patches = ref_patches.transpose(0, 2, 4, 1, 3, 5).reshape(
        batch_seq, hp * wp, C * patch_size * patch_size)
    ref = jnp.matmul(ref_patches, weight, precision="highest")

    # 1) Default path (fused unfold if it lowers, otherwise auto-fallback); exact f32.
    out_def = jax.block_until_ready(patch_embedding(image, weight, patch_size))
    assert out_def.shape == (batch_seq, hp * wp, patch_dim)
    assert jnp.allclose(out_def, ref, atol=1e-3, rtol=1e-3)

    # 2) Unfused tiled-matmul path; exact f32.
    out_unf = jax.block_until_ready(
        patch_embedding(image, weight, patch_size, fuse_unfold=False))
    assert out_unf.shape == (batch_seq, hp * wp, patch_dim)
    assert jnp.allclose(out_unf, ref, atol=1e-3, rtol=1e-3)

    # 3) bf16 compute + bf16 output fast path (f32 accumulation inside the MXU).
    out_bf16 = jax.block_until_ready(
        patch_embedding(image, weight, patch_size,
                        compute_dtype=jnp.bfloat16, out_dtype=jnp.bfloat16))
    assert out_bf16.shape == (batch_seq, hp * wp, patch_dim)
    assert out_bf16.dtype == jnp.bfloat16
    rel_err = (jnp.linalg.norm(out_bf16.astype(jnp.float32) - ref)
               / jnp.linalg.norm(ref))
    assert rel_err < 2e-2

    print("KERNEL_OK")
</pallas_src>

<mosaic_0001>
module attributes {stable_mosaic.version = 11 : i64} {
  func.func @kernel(%arg0: i32, %arg1: memref<1x3x16x16xf32, #tpu.memory_space<vmem>>, %arg2: memref<48x128xf32, #tpu.memory_space<vmem>>, %arg3: memref<1x16x128xf32, #tpu.memory_space<vmem>>) attributes {dimension_semantics = [#tpu.dimension_semantics<parallel>], iteration_bounds = array<i64: 2>, scalar_prefetch = 0 : i64, scratch_operands = 0 : i64, tpu.core_type = #tpu.core_type<tc>, window_params = [{transform_indices = @transform_0, window_bounds = array<i64: 1, 3, 16, 16>}, {pipeline_mode = #tpu.pipeline_mode<synchronous>, transform_indices = @transform_1, window_bounds = array<i64: 48, 128>}, {transform_indices = @transform_2, window_bounds = array<i64: 1, 16, 128>}]} {
    %c0 = arith.constant 0 : index
    %c0_0 = arith.constant 0 : index
    %c0_1 = arith.constant 0 : index
    %c0_2 = arith.constant 0 : index
    %0 = vector.load %arg1[%c0, %c0_0, %c0_1, %c0_2] : memref<1x3x16x16xf32, #tpu.memory_space<vmem>>, vector<1x3x16x16xf32>
    %1 = vector.shape_cast %0 : vector<1x3x16x16xf32> to vector<3x16x16xf32>
    %2 = vector.shape_cast %1 : vector<3x16x16xf32> to vector<3x4x4x4x4xf32>
    %3 = tpu.transpose %2, [1, 3, 0, 2, 4] : vector<3x4x4x4x4xf32> -> vector<4x4x3x4x4xf32>
    %4 = vector.shape_cast %3 : vector<4x4x3x4x4xf32> to vector<16x48xf32>
    %c0_3 = arith.constant 0 : index
    %c0_4 = arith.constant 0 : index
    %5 = vector.load %arg2[%c0_3, %c0_4] : memref<48x128xf32, #tpu.memory_space<vmem>>, vector<48x128xf32>
    %cst = arith.constant dense<0.000000e+00> : vector<16x128xf32>
    %6 = tpu.matmul %4, %5, %cst {dimension_numbers = #tpu.dot_dimension_numbers<[1], [0], [0], [1], [0, 0, 1, 1], [], []>} : vector<16x48xf32>, vector<48x128xf32>, vector<16x128xf32> -> vector<16x128xf32>
    %c0_5 = arith.constant 0 : index
    %c0_6 = arith.constant 0 : index
    %c0_7 = arith.constant 0 : index
    %7 = vector.load %arg3[%c0_5, %c0_6, %c0_7] : memref<1x16x128xf32, #tpu.memory_space<vmem>>, vector<1x16x128xf32>
    %8 = vector.shape_cast %7 : vector<1x16x128xf32> to vector<16x128xf32>
    %9 = vector.shape_cast %6 : vector<16x128xf32> to vector<1x16x128xf32>
    tpu.vector_store %arg3[%c0_5, %c0_6, %c0_7], %9 {strides = array<i32>} : memref<1x16x128xf32, #tpu.memory_space<vmem>>, vector<1x16x128xf32>,
    return
  }
  func.func @transform_0(%arg0: i32) -> (i32, i32, i32, i32) {
    %c0_i32 = arith.constant 0 : i32
    %c0_i32_0 = arith.constant 0 : i32
    %c0_i32_1 = arith.constant 0 : i32
    %c0_i32_2 = arith.constant 0 : i32
    return %arg0, %c0_i32, %c0_i32_0, %c0_i32_1 : i32, i32, i32, i32
  }
  func.func @transform_1(%arg0: i32) -> (i32, i32) {
    %c0_i32 = arith.constant 0 : i32
    %c0_i32_0 = arith.constant 0 : i32
    %c0_i32_1 = arith.constant 0 : i32
    return %c0_i32, %c0_i32_0 : i32, i32
  }
  func.func @transform_2(%arg0: i32) -> (i32, i32, i32) {
    %c0_i32 = arith.constant 0 : i32
    %c0_i32_0 = arith.constant 0 : i32
    %c0_i32_1 = arith.constant 0 : i32
    return %arg0, %c0_i32, %c0_i32_0 : i32, i32, i32
  }
}

module attributes {stable_mosaic.version = 11 : i64} {
  func.func @_matmul_kernel(%arg0: i32, %arg1: memref<32x48xf32, #tpu.memory_space<vmem>>, %arg2: memref<48x128xf32, #tpu.memory_space<vmem>>, %arg3: memref<32x128xf32, #tpu.memory_space<vmem>>) attributes {dimension_semantics = [#tpu.dimension_semantics<parallel>], iteration_bounds = array<i64: 1>, scalar_prefetch = 0 : i64, scratch_operands = 0 : i64, tpu.core_type = #tpu.core_type<tc>, window_params = [{transform_indices = @transform_0, window_bounds = array<i64: 32, 48>}, {pipeline_mode = #tpu.pipeline_mode<synchronous>, transform_indices = @transform_1, window_bounds = array<i64: 48, 128>}, {transform_indices = @transform_2, window_bounds = array<i64: 32, 128>}]} {
    %c0 = arith.constant 0 : index
    %c0_0 = arith.constant 0 : index
    %0 = vector.load %arg1[%c0, %c0_0] : memref<32x48xf32, #tpu.memory_space<vmem>>, vector<32x48xf32>
    %c0_1 = arith.constant 0 : index
    %c0_2 = arith.constant 0 : index
    %1 = vector.load %arg2[%c0_1, %c0_2] : memref<48x128xf32, #tpu.memory_space<vmem>>, vector<48x128xf32>
    %cst = arith.constant dense<0.000000e+00> : vector<32x128xf32>
    %2 = tpu.matmul %0, %1, %cst {dimension_numbers = #tpu.dot_dimension_numbers<[1], [0], [0], [1], [0, 0, 1, 1], [], []>} : vector<32x48xf32>, vector<48x128xf32>, vector<32x128xf32> -> vector<32x128xf32>
    %c0_3 = arith.constant 0 : index
    %c0_4 = arith.constant 0 : index
    %3 = vector.load %arg3[%c0_3, %c0_4] : memref<32x128xf32, #tpu.memory_space<vmem>>, vector<32x128xf32>
    tpu.vector_store %arg3[%c0_3, %c0_4], %2 {strides = array<i32>} : memref<32x128xf32, #tpu.memory_space<vmem>>, vector<32x128xf32>,
    return
  }
  func.func @transform_0(%arg0: i32) -> (i32, i32) {
    %c0_i32 = arith.constant 0 : i32
    %c0_i32_0 = arith.constant 0 : i32
    return %arg0, %c0_i32 : i32, i32
  }
  func.func @transform_1(%arg0: i32) -> (i32, i32) {
    %c0_i32 = arith.constant 0 : i32
    %c0_i32_0 = arith.constant 0 : i32
    %c0_i32_1 = arith.constant 0 : i32
    return %c0_i32, %c0_i32_0 : i32, i32
  }
  func.func @transform_2(%arg0: i32) -> (i32, i32) {
    %c0_i32 = arith.constant 0 : i32
    %c0_i32_0 = arith.constant 0 : i32
    return %arg0, %c0_i32 : i32, i32
  }
}

</mosaic_0001>

<bundles_post_ra>
// kernel: tpu_custom_call.1
= control target key start
LH: loop header
LB: loop body
LE: loop exit
PB: predicated region body
PF: predicated region fallthrough
CT: control target
= control target key end

     0   :  { %7 = vsyncpa [#allocation3], 0  ;;  %s366_s0 = inlined_call_operand.hbm [shape: f32[32,48], index: 0, kind: input, shape index: {}]   ;;  %s367_s1 = inlined_call_operand.hbm [shape: f32[48,128], index: 1, kind: input, shape index: {}]   ;;  %s368_s2 = inlined_call_operand.hbm [shape: f32[32,128], index: 2, kind: output, shape index: {}]  }
   0x1   :  { %8 = vsyncpa [#allocation6], 0 }
   0x2   :  { %9 = vsyncpa [#allocation4], 0  ;;  %s297_s9 = smov [#allocation2]   ;;  %s225_s13 = scalar_lea.hbm %s366_s0, 512 }
   0x3   :  { %s15_s10 = sshll.u32 %s297_s9, 4  ;;  %p226_p0 = scmp.ne.s32.totalorder %s366_s0, %s225_s13  ;;  %s16_s10 = int_to_ptr.vmem [resolvable:$true] %s15_s10 }
   0x4   :  { %p229_p1 = scmp.lt.u32.totalorder %s225_s13, %s366_s0 }
   0x6   :  { %p231_p2 = pnand %p229_p1, %p226_p0 }
   0x8   :  { %234 = shalt.err (!%p231_p2)
}
   0x9   :  { %s235_s18 = scalar_lea.vmem %s16_s10, 512  ;;  %p240_p4 = scmp.lt.s32.totalorder %s16_s10, %s16_s10 }
   0xa   :  { %p236_p3 = scmp.ne.s32.totalorder %s16_s10, %s235_s18  ;;  %p241_p5 = scmp.lt.s32.totalorder %s235_s18, %s235_s18 }
   0xc   :  { %p242_p6 = por %p241_p5, %p240_p4 }
   0xe   :  { %p243_p7 = pnand %p242_p6, %p236_p3 }
  0x10   :  { %246 = shalt.err (!%p243_p7)
}
  0x11   :  { %s298_s19 = smov 128   ;;  %s299_s20 = smov 8  }
  0x12   :  { %21 = dma.hbm_to_vmem [thread:$0]  %s366_s0, 512, %s16_s10, [#allocation3], %s298_s19, %s298_s19, %s299_s20  }
  0x13   :  { %s300_s23 = smov [#allocation5]   ;;  %s247_s27 = scalar_lea.hbm %s367_s1, 768 }
  0x14   :  { %s27_s24 = sshll.u32 %s300_s23, 4  ;;  %p248_p8 = scmp.ne.s32.totalorder %s367_s1, %s247_s27  ;;  %s28_s24 = int_to_ptr.vmem [resolvable:$true] %s27_s24 }
  0x15   :  { %p251_p9 = scmp.lt.u32.totalorder %s247_s27, %s367_s1 }
  0x17   :  { %p253_p10 = pnand %p251_p9, %p248_p8 }
  0x19   :  { %256 = shalt.err (!%p253_p10)
}
  0x1a   :  { %s257_s4 = scalar_lea.vmem %s28_s24, 768  ;;  %p262_p12 = scmp.lt.s32.totalorder %s28_s24, %s28_s24 }
  0x1b   :  { %p258_p11 = scmp.ne.s32.totalorder %s28_s24, %s257_s4  ;;  %p263_p13 = scmp.lt.s32.totalorder %s257_s4, %s257_s4 }
  0x1d   :  { %p264_p0 = por %p263_p13, %p262_p12 }
  0x1f   :  { %p265_p1 = pnand %p264_p0, %p258_p11 }
  0x21   :  { %268 = shalt.err (!%p265_p1)
}
  0x22   :  { %33 = dma.hbm_to_vmem [thread:$0]  %s367_s1, 768, %s28_s24, [#allocation6], %s298_s19, %s298_s19, %s299_s20  }
  0x23   :  { %291 = dma.done.wait [#allocation3], 512  }
  0x24   :  { %292 = vsyncadd [#allocation3], 4294966784 }
  0x25   :  { %293 = dma.done.wait [#allocation6], 768  }
  0x26   :  { %294 = vsyncadd [#allocation6], 4294966528  ;;  %v44_v0 = vld [vmem:[#allocation5] sm:$0xff]  ;;  %v45_v1 = vld [vmem:[#allocation5 + $0x8] sm:$0xff]  ;;  %vm50_vm0 = vcmask 392192   ;;  %s301_s1 = smov [#allocation7]  }
  0x27   :  { %v46_v2 = vld [vmem:[#allocation5 + $0x10] sm:$0xff]  ;;  %v202_v3 = vpack.c.bf16 %v45_v1, %v44_v0  ;;  %v47_v4 = vld [vmem:[#allocation5 + $0x18] sm:$0xff]  ;;  %v48_v6 = vld [vmem:[#allocation5 + $0x20] sm:$0xff]  ;;  %s157_s6 = sshll.u32 %s301_s1, 4  ;;  %s158_s6 = int_to_ptr.vmem [resolvable:$true] %s157_s6 }
  0x28   :  { %v206_v5 = vpack.c.bf16 %v47_v4, %v46_v2  ;;  %v49_v7 = vld [vmem:[#allocation5 + $0x28] sm:$0xff]  ;;  %v40_v8 = vld [vmem:[#allocation2] sm:$0xff]  ;;  %v42_v9 = vld [vmem:[#allocation2 + $0x10] sm:$0xff]  ;;  %s269_s7 = scalar_lea.vmem %s158_s6, 512  ;;  %p274_p3 = scmp.lt.s32.totalorder %s158_s6, %s158_s6 }
  0x29   :  { %203 = vmatprep.subr.bf16.mxu0 %v202_v3  ;;  %214 = vmatprep.subr.bf16.mxu1 %v202_v3  ;;  %v210_v10 = vpack.c.bf16 %v49_v7, %v48_v6  ;;  %v41_v11 = vld [vmem:[#allocation2 + $0x8] sm:$0xff]  ;;  %v43_v12 = vld [vmem:[#allocation2 + $0x18] sm:$0xff]  ;;  %p270_p2 = scmp.ne.s32.totalorder %s158_s6, %s269_s7  ;;  %p275_p4 = scmp.lt.s32.totalorder %s269_s7, %s269_s7 }
  0x2a   :  { %205 = vmatpush3.bf16.msra.mxu0 %v202_v3  ;;  %217 = vmatpush3.bf16.msra.mxu1 %v202_v3 }
  0x2b   :  { %207 = vmatprep.subr.bf16.mxu0 %v206_v5  ;;  %215 = vmatprep.subr.bf16.mxu1 %v206_v5  ;;  %p276_p5 = por %p275_p4, %p274_p3 }
  0x2c   :  { %196 = vmatprep.mubr.msk.f32.mxu0 %vm50_vm0, %v40_v8  ;;  %199 = vmatprep.mubr.msk.f32.mxu1 %vm50_vm0, %v42_v9 }
  0x2d   :  { %p277_p6 = pnand %p276_p5, %p270_p2 }
  0x2e   :  { %209 = vmatpush3.bf16.msra.mxu0 %v206_v5  ;;  %218 = vmatpush3.bf16.msra.mxu1 %v206_v5 }
  0x2f   :  { %211 = vmatprep.subr.bf16.mxu0 %v210_v10  ;;  %216 = vmatprep.subr.bf16.mxu1 %v210_v10 }
  0x32   :  { %213 = vmatpush3.bf16.msra.mxu0 %v210_v10  ;;  %219 = vmatpush3.bf16.msra.mxu1 %v210_v10 }
  0x35   :  { %197 = vmatmul.mubr.msk.f32.vlgmr.msra.gmra.mrb[0].mxu0 %vm50_vm0, %v41_v11  ;;  %200 = vmatmul.mubr.msk.f32.vlgmr.msra.gmra.mrb[0].mxu1 %vm50_vm0, %v43_v12 }
 0x108   :  { %v198_v13 = vpop.f32.mrb[0].mxu0  ;;  %v201_v14 = vpop.f32.mrb[0].mxu1 }
 0x109   :  { %149 = vst [vmem:[#allocation7 + $0x8] sm:$0xff] %v198_v13  ;;  %151 = vst [vmem:[#allocation7 + $0x18] sm:$0xff] %v201_v14  ;;  %v129_v15 = vpop.f32.mrb[1].mxu0  ;;  %v139_v16 = vpop.f32.mrb[1].mxu1 }
 0x10a   :  { %148 = vst [vmem:[#allocation7] sm:$0xff] %v129_v15  ;;  %150 = vst [vmem:[#allocation7 + $0x10] sm:$0xff] %v139_v16 }
 0x10b   :  { %280 = shalt.err (!%p277_p6)
}
 0x10c   :  { %s281_s10 = scalar_lea.hbm %s368_s2, 512 }
 0x10d   :  { %p282_p7 = scmp.ne.s32.totalorder %s368_s2, %s281_s10  ;;  %p285_p8 = scmp.lt.u32.totalorder %s281_s10, %s368_s2 }
 0x10f   :  { %p287_p9 = pnand %p285_p8, %p282_p7 }
 0x111   :  { %290 = shalt.err (!%p287_p9)
}
 0x112   :  { %163 = dma.vmem_to_hbm [thread:$0]  %s158_s6, 512, %s368_s2, [#allocation4], %s298_s19, %s298_s19, %s299_s20  }
 0x113   :  { %295 = dma.done.wait [#allocation4], 512  }
 0x114   :  { %296 = vsyncadd [#allocation4], 4294966784 }
 0x115   :  { %167 = vsyncpa [#allocation3], 1 }
 0x116   :  { %168 = vsyncpa [#allocation6], 1 }
 0x117   :  { %169 = vsyncpa [#allocation4], 1 }

</bundles_post_ra>
